<compile_context>
chip_gen: v5e
topology: v5e:2x2
jax: 0.10.0
libtpu: 0.0.40
codegen_flags: <defaults>
</compile_context>

<pallas_src>
import functools

import jax
import jax.numpy as jnp
from jax import lax
from jax.experimental import pallas as pl
from jax.experimental.pallas import tpu as pltpu


def _round_up(x, m):
    return (x + m - 1) // m * m


def _orth_loss_kernel(x_ref, out_ref, *, classes0, tb, total_b, needs_bmask):
    x = x_ref[...]                                   # (TB, N, D), input dtype
    n = x.shape[1]

    # Gram matrix straight from the raw tile on the MXU, f32 accumulation.
    sim = jnp.einsum("bnd,bmd->bnm", x, x, preferred_element_type=jnp.float32)

    # Normalize via the Gram diagonal: one rsqrt per row (EUP), two cheap rescales.
    xf = x.astype(jnp.float32)
    inv = lax.rsqrt(jnp.sum(xf * xf, axis=-1))       # (TB, N) f32
    sim = sim * inv[:, :, None] * inv[:, None, :]

    # Keep mask built in-kernel (no resident input): off-diagonal, row >= classes[0].
    r = lax.broadcasted_iota(jnp.int32, (1, n, n), 1)
    c = lax.broadcasted_iota(jnp.int32, (1, n, n), 2)
    keep = (r != c) & (r >= classes0)
    if needs_bmask:  # only when B was padded up to a multiple of TB
        b = pl.program_id(0)
        bidx = b * tb + lax.broadcasted_iota(jnp.int32, (tb, 1, 1), 0)
        keep = keep & (bidx < total_b)

    sim = jnp.where(keep, sim, 0.0)                  # zeroes padded / masked entries
    s = jnp.sum(jnp.abs(sim))                        # abs(0) == 0, no extra gate needed
    cnt = jnp.sum((sim != 0.0).astype(jnp.float32))  # mirrors torch `sim[sim != 0]`

    # Pack both scalars into a single lane-dense (1, 8, 128) partial tile:
    # lane 0 = sum of |sim|, lane 1 = nonzero count.
    lane = lax.broadcasted_iota(jnp.int32, out_ref.shape, 2)
    out_ref[...] = jnp.where(lane == 0, s, jnp.where(lane == 1, cnt, 0.0))


def _vmem_budget():
    """Generation-aware (per-step tile budget, scoped VMEM limit) in bytes."""
    try:
        phys = pltpu.get_tpu_info().vmem_capacity_bytes
    except Exception:
        phys = 64 * 1024 * 1024
    if phys >= 96 * 1024 * 1024:                     # v5e / v6e: 128 MiB physical
        return 48 * 1024 * 1024, 96 * 1024 * 1024
    return 24 * 1024 * 1024, 48 * 1024 * 1024        # v7x: 64 MiB physical


def _choose_tb_cap(B, N, D, itemsize, budget):
    """Biggest per-step batch tile whose working set stays inside `budget`."""
    sub = {4: 8, 2: 16, 1: 32}.get(itemsize, 8)      # dtype-specific sublane multiple
    nl, dl = _round_up(N, sub), _round_up(D, 128)    # input-dtype layout tile
    n8, n128 = _round_up(N, 8), _round_up(N, 128)    # f32 layout tile for sim
    per_b = 2 * nl * dl * itemsize                   # double-buffered input block
    per_b += nl * dl * 4                             # f32 work copy for the row norms
    per_b += 3 * n8 * n128 * 4                       # sim + masked/abs f32 intermediates
    fixed = n8 * n128 * 4                            # keep-mask / iota temporaries
    fixed += 2 * 2 * 8 * 128 * 4                     # tiny packed output buffers
    return int(max(1, min(B, (budget - fixed) // per_b)))


def _pick_tb(B, cap):
    """Prefer a TB that divides B (no host-side batch pad copy); else pad + mask."""
    cap = int(max(1, min(cap, B)))
    best = 1
    for tb in range(cap, 0, -1):
        if B % tb == 0:
            best = tb
            break
    if best * 4 >= cap:            # divisor close enough to the cap: skip the pad copy
        return best, False
    return cap, True               # rare: pad batch up to a multiple of `cap`


def orthogonal_loss(class_token, classes, weight=1.0):
    """class_token: (B, N, D) float array. classes: sequence, only classes[0] is used."""
    B, N, D = class_token.shape
    classes0 = int(classes[0])

    budget, vmem_limit = _vmem_budget()
    cap = _choose_tb_cap(B, N, D, class_token.dtype.itemsize, budget)
    if B > 1:
        cap = min(cap, -(-B // 2))  # NB >= 2 keeps both v7x TensorCores busy
    TB, needs_pad = _pick_tb(B, cap)

    x = class_token
    if needs_pad:
        Bp = _round_up(B, TB)
        x = jnp.pad(x, ((0, Bp - B), (0, 0), (0, 0)))
    NB = x.shape[0] // TB

    kernel = functools.partial(
        _orth_loss_kernel, classes0=classes0, tb=TB, total_b=B, needs_bmask=needs_pad
    )

    parts = pl.pallas_call(
        kernel,
        out_shape=jax.ShapeDtypeStruct((NB, 8, 128), jnp.float32),
        grid_spec=pltpu.PrefetchScalarGridSpec(
            num_scalar_prefetch=0,
            grid=(NB,),
            in_specs=[
                # Full (unpadded) N, D extents — no host-side pad of the input.
                pl.BlockSpec((TB, N, D), lambda b: (b, 0, 0)),
            ],
            out_specs=pl.BlockSpec((1, 8, 128), lambda b: (b, 0, 0)),
        ),
        compiler_params=pltpu.CompilerParams(
            dimension_semantics=("parallel",),       # megacore-friendly on v7x
            vmem_limit_bytes=vmem_limit,
        ),
    )(x)

    total_sum = jnp.sum(parts[:, 0, 0])
    total_cnt = jnp.sum(parts[:, 0, 1])
    # NOTE: like PyTorch's `.mean()` over an empty selection (e.g. classes[0] >= N),
    # this yields NaN when total_cnt == 0 — semantics preserved on purpose.
    return (total_sum / total_cnt) * jnp.asarray(weight, jnp.float32)


def orthogonal_loss_ref(class_token, classes, weight=1.0):
    """Pure-JAX reference mirroring the PyTorch forward."""
    x = class_token / jnp.linalg.norm(class_token, axis=-1, keepdims=True)
    sim = jnp.einsum("bnd,bmd->bnm", x, x)
    B, N, _ = sim.shape
    eye = jnp.eye(N, dtype=bool)[None]
    sim = jnp.where(eye, 0.0, sim)
    row = jnp.arange(N)[None, :, None]
    sim = jnp.where(row < classes[0], 0.0, sim)
    nz = sim != 0.0
    return (jnp.sum(jnp.where(nz, jnp.abs(sim), 0.0)) / jnp.sum(nz)) * weight


if __name__ == "__main__":
    key = jax.random.PRNGKey(0)
    B, N, D = 2, 8, 32          # batch, class tokens, hidden dim
    classes = (2,)              # zero out the first 2 rows of the similarity
    weight = 1.0

    class_token = jax.random.normal(key, (B, N, D), dtype=jnp.float32)

    loss = orthogonal_loss(class_token, classes, weight)
    loss = jax.block_until_ready(loss)

    ref = orthogonal_loss_ref(class_token, classes, weight)
    assert jnp.allclose(loss, ref, rtol=1e-5, atol=1e-6), (loss, ref)

    print("KERNEL_OK")
</pallas_src>

<mosaic_0001>
module attributes {stable_mosaic.version = 11 : i64} {
  func.func @_orth_loss_kernel(%arg0: i32, %arg1: memref<1x8x32xf32, #tpu.memory_space<vmem>>, %arg2: memref<1x8x128xf32, #tpu.memory_space<vmem>>) attributes {dimension_semantics = [#tpu.dimension_semantics<parallel>], iteration_bounds = array<i64: 2>, scalar_prefetch = 0 : i64, scratch_operands = 0 : i64, tpu.core_type = #tpu.core_type<tc>, window_params = [{transform_indices = @transform_0, window_bounds = array<i64: 1, 8, 32>}, {transform_indices = @transform_1, window_bounds = array<i64: 1, 8, 128>}]} {
    %c0 = arith.constant 0 : index
    %c0_0 = arith.constant 0 : index
    %c0_1 = arith.constant 0 : index
    %0 = vector.load %arg1[%c0, %c0_0, %c0_1] : memref<1x8x32xf32, #tpu.memory_space<vmem>>, vector<1x8x32xf32>
    "tpu.trace_start"() <{level = 10 : i32, message = "bnd,bmd->bnm"}> : () -> ()
    %cst = arith.constant dense<0.000000e+00> : vector<1x8x8xf32>
    %1 = tpu.matmul %0, %0, %cst {dimension_numbers = #tpu.dot_dimension_numbers<[2], [2], [1], [1], [0, 0, 0, 1, 1, 1], [0], [0]>} : vector<1x8x32xf32>, vector<1x8x32xf32>, vector<1x8x8xf32> -> vector<1x8x8xf32>
    "tpu.trace_stop"() : () -> ()
    %2 = arith.mulf %0, %0 : vector<1x8x32xf32>
    %cst_2 = arith.constant dense<0.000000e+00> : vector<1x8xf32>
    %3 = vector.multi_reduction <add>, %2, %cst_2 [2] : vector<1x8x32xf32> to vector<1x8xf32>
    %4 = math.rsqrt %3 : vector<1x8xf32>
    %5 = vector.shape_cast %4 : vector<1x8xf32> to vector<1x8x1xf32>
    %6 = vector.broadcast %5 : vector<1x8x1xf32> to vector<1x8x8xf32>
    %7 = arith.mulf %1, %6 : vector<1x8x8xf32>
    %8 = vector.shape_cast %4 : vector<1x8xf32> to vector<1x1x8xf32>
    %9 = vector.broadcast %8 : vector<1x1x8xf32> to vector<1x8x8xf32>
    %10 = arith.mulf %7, %9 : vector<1x8x8xf32>
    %11 = tpu.iota {dimensions = array<i32: 1>} : vector<1x8x8xi32>
    %12 = tpu.iota {dimensions = array<i32: 2>} : vector<1x8x8xi32>
    %13 = arith.cmpi ne, %11, %12 : vector<1x8x8xi32>
    %c2_i32 = arith.constant 2 : i32
    %14 = vector.broadcast %c2_i32 : i32 to vector<1x8x8xi32>
    %15 = arith.cmpi sge, %11, %14 : vector<1x8x8xi32>
    %16 = arith.andi %13, %15 : vector<1x8x8xi1>
    %cst_3 = arith.constant 0.000000e+00 : f32
    %17 = vector.broadcast %cst_3 : f32 to vector<1x8x8xf32>
    %18 = arith.select %16, %10, %17 : vector<1x8x8xi1>, vector<1x8x8xf32>
    %19 = math.absf %18 : vector<1x8x8xf32>
    %20 = vector.shape_cast %19 : vector<1x8x8xf32> to vector<1x1x8x8xf32>
    %cst_4 = arith.constant dense<0.000000e+00> : vector<1xf32>
    %21 = vector.multi_reduction <add>, %20, %cst_4 [1, 2, 3] : vector<1x1x8x8xf32> to vector<1xf32>
    %22 = vector.shape_cast %21 : vector<1xf32> to vector<1x1x1x1xf32>
    %23 = vector.extract %22[0, 0, 0, 0] : f32 from vector<1x1x1x1xf32>
    %cst_5 = arith.constant 0.000000e+00 : f32
    %24 = vector.broadcast %cst_5 : f32 to vector<1x8x8xf32>
    %25 = arith.cmpf one, %18, %24 : vector<1x8x8xf32>
    %26 = arith.extui %25 : vector<1x8x8xi1> to vector<1x8x8xi32>
    %27 = arith.sitofp %26 : vector<1x8x8xi32> to vector<1x8x8xf32>
    %28 = vector.shape_cast %27 : vector<1x8x8xf32> to vector<1x1x8x8xf32>
    %cst_6 = arith.constant dense<0.000000e+00> : vector<1xf32>
    %29 = vector.multi_reduction <add>, %28, %cst_6 [1, 2, 3] : vector<1x1x8x8xf32> to vector<1xf32>
    %30 = vector.shape_cast %29 : vector<1xf32> to vector<1x1x1x1xf32>
    %31 = vector.extract %30[0, 0, 0, 0] : f32 from vector<1x1x1x1xf32>
    %32 = tpu.iota {dimensions = array<i32: 2>} : vector<1x8x128xi32>
    %c0_i32 = arith.constant 0 : i32
    %33 = vector.broadcast %c0_i32 : i32 to vector<1x8x128xi32>
    %34 = arith.cmpi eq, %32, %33 : vector<1x8x128xi32>
    %c1_i32 = arith.constant 1 : i32
    %35 = vector.broadcast %c1_i32 : i32 to vector<1x8x128xi32>
    %36 = arith.cmpi eq, %32, %35 : vector<1x8x128xi32>
    %cst_7 = arith.constant 0.000000e+00 : f32
    %37 = vector.broadcast %31 : f32 to vector<1x8x128xf32>
    %38 = vector.broadcast %cst_7 : f32 to vector<1x8x128xf32>
    %39 = arith.select %36, %37, %38 : vector<1x8x128xi1>, vector<1x8x128xf32>
    %40 = vector.broadcast %23 : f32 to vector<1x8x128xf32>
    %41 = arith.select %34, %40, %39 : vector<1x8x128xi1>, vector<1x8x128xf32>
    %c0_8 = arith.constant 0 : index
    %c0_9 = arith.constant 0 : index
    %c0_10 = arith.constant 0 : index
    %42 = vector.load %arg2[%c0_8, %c0_9, %c0_10] : memref<1x8x128xf32, #tpu.memory_space<vmem>>, vector<1x8x128xf32>
    tpu.vector_store %arg2[%c0_8, %c0_9, %c0_10], %41 {strides = array<i32>} : memref<1x8x128xf32, #tpu.memory_space<vmem>>, vector<1x8x128xf32>,
    return
  }
  func.func @transform_0(%arg0: i32) -> (i32, i32, i32) {
    %c0_i32 = arith.constant 0 : i32
    %c0_i32_0 = arith.constant 0 : i32
    %c0_i32_1 = arith.constant 0 : i32
    return %arg0, %c0_i32, %c0_i32_0 : i32, i32, i32
  }
  func.func @transform_1(%arg0: i32) -> (i32, i32, i32) {
    %c0_i32 = arith.constant 0 : i32
    %c0_i32_0 = arith.constant 0 : i32
    %c0_i32_1 = arith.constant 0 : i32
    return %arg0, %c0_i32, %c0_i32_0 : i32, i32, i32
  }
}

</mosaic_0001>

<bundles_post_ra>
// kernel: tpu_custom_call.1
= control target key start
LH: loop header
LB: loop body
LE: loop exit
PB: predicated region body
PF: predicated region fallthrough
CT: control target
= control target key end

     0   :  { %6 = vsyncpa [#allocation3], 0  ;;  %s624_s0 = inlined_call_operand.hbm [shape: f32[2,8,32], index: 0, kind: input, shape index: {}]   ;;  %s625_s1 = inlined_call_operand.hbm [shape: f32[2,8,128], index: 1, kind: output, shape index: {}]  }
   0x1   :  { %8 = vsyncpa [#allocation3 + $0x1], 0 }
   0x2   :  { %9 = vsyncpa [#allocation4], 0 }
   0x3   :  { %11 = vsyncpa [#allocation4 + $0x1], 0  ;;  %s493_s6 = smov 0   ;;  %s495_s7 = smov 0  }
   0x4   :  { %s497_s8 = smov 0   ;;  %s499_s9 = smov 0  }
   0x5 LB: > { %s514_s10 = sadd.s32 4294967295, %s480_s9   ;;  %s316_s11 = sadd.s32 4294967294, %s480_s9   ;;  %s480_s9 = sphi %s499_s9, %s635_s9   ;;  %s476_s8 = sphi %s497_s8, %s634_s8   ;;  %s472_s7 = sphi %s495_s7, %s633_s7   ;;  %s468_s6 = sphi %s493_s6, %s632_s6  }
   0x6   : > { %s518_s12 = sadd.s32 1, %s480_s9   ;;  %s24_s13 = sadd.s32 1, %s476_s8 }
   0x7   : > { %s21_s14 = ssub.s32 %s480_s9, %s518_s12  ;;  %p31_p0 = scmp.ne.s32.totalorder %s476_s8, %s472_s7 }
   0x8   : > { %p22_p1 = scmp.eq.s32.totalorder %s21_s14, 0  ;;  %p32_p2 = scmp.eq.s32.totalorder %s480_s9, 0 }
   0x9   : > { %p37_p3 = scmp.ne.s32.totalorder %s472_s7, %s468_s6  ;;  %p38_p4 = scmp.eq.s32.totalorder %s514_s10, 0 }
   0xa   : > { %s530_s15 = scalar_select %p22_p1, %s476_s8, %s24_s13  }
   0xb   : > { %p532_p5 = por %p32_p2, %p31_p0  ;;  %p536_p6 = por %p38_p4, %p37_p3 }
   0xc   : > { %p61_p7 = scmp.eq.s32.totalorder %s514_s10, 1  ;;  %p67_p8 = scmp.eq.s32.totalorder %s316_s11, 1 }
   0xd   : > { %p347_p10 = scmp.lt.s32.totalorder %s480_s9, 2  ;;  %s87_s20 = sand.u32 1, %s476_s8  }
   0xe   : > { %p543_p11 = por %p61_p7, %p31_p0  ;;  %p547_p12 = por %p67_p8, %p37_p3 }
   0xf   : > { %s320_s21 = sshll.u32 %s480_s9, 3  ;;  %s319_s22 = sshll.u32 %s87_s20, 3 }
  0x10   : > { %s95_s25 = scalar_lea.hbm %s624_s0, %s320_s21  ;;  %s91_s27 = scalar_lea.vmem [#allocation2], %s319_s22 }
  0x11   : > { %s97_s26 = sshll.u32 %s95_s25, 4  ;;  %s99_s28 = sshll.u32 %s91_s27, 4  ;;  %s98_s26 = int_to_ptr.hbm [resolvable:$true] %s97_s26  ;;  %s100_s28 = int_to_ptr.vmem [resolvable:$true] %s99_s28 }
  0x12   : > { %p558_p13 = pnand %p347_p10, %p532_p5  ;;  %p321_p0 = scmp.ge.s32.totalorder %s480_s9, 1 }
  0x13   : > { %p104_p1 = scmp.lt.s32.totalorder %s480_s9, 3  ;;  %s88_s30 = scalar_lea.sflag [#allocation3], %s87_s20 }
  0x14   : > { %s384_s2 = sshra.s32 %s98_s26, 4  ;;  %p388_p3 = pneg %p558_p13  ;;  %s385_s2 = int_to_ptr.hbm [resolvable:$true] %s384_s2 }
  0x15   : > { %s386_s3 = scalar_lea.hbm %s385_s2, 8  ;;  %s391_s11 = scalar_lea.hbm %s624_s0, 16 }
  0x16   : > { %p387_p2 = scmp.ne.s32.totalorder %s385_s2, %s386_s3  ;;  %p392_p5 = scmp.lt.s32.totalorder %s385_s2, %s624_s0 }
  0x17   : > { %p393_p8 = scmp.lt.s32.totalorder %s391_s11, %s386_s3 }
  0x18   : > { %p389_p4 = pnand %p388_p3, %p387_p2 }
  0x19   : > { %p394_p10 = por %p393_p8, %p392_p5 }
  0x1a   : > { %p390_p7 = pneg %p389_p4 }
  0x1c   : > { %p395_p9 = pnand %p394_p10, %p390_p7 }
  0x1e   : > { %398 = shalt.err (!%p395_p9)
}
  0x1f   : > { %342 = dma.hbm_to_vmem [thread:$0]  (!%p558_p13), %s98_s26, 128, %s100_s28, %s88_s30  }
  0x20   : > { %p105_p2 = pnand %p321_p0, %p104_p1 }
  0x21   : > { %s579_s16 = sand.u32 (!%p105_p2), 1, %s472_s7  }
  0x22   : > { %108 = sbr.rel (%p105_p2) target bundleno = 371 (0x173), region = 24  ;;  %s322_s20 = sshll.u32 (!%p105_p2), %s579_s16, 3 }
  0x23   : > { %s111_s21 = scalar_lea.sflag (!%p105_p2), [#allocation3], %s579_s16  ;;  %s114_s22 = scalar_lea.vmem (!%p105_p2), [#allocation2], %s322_s20 }
  0x27   : > { %459 = dma.done.wait (%p536_p6), %s111_s21, 128  }
  0x28   : > { %461 = vsyncadd (%p536_p6), %s111_s21, 4294967168  ;;  %v134_v0 = vld [vmem:[%s114_s22] sm:$0xff]  ;;  %vm135_vm0 = vcmask 261120   ;;  %v175_v7 = vlaneseq  ;;  %vm199_vm7 = vcmask 64512   ;;  %v482_v20 = vmov 0.0   ;;  %s328_s17 = sshll.u32 %s514_s10, 3 }
  0x29   : > { %v159_v1 = vmul.f32 %v134_v0, %v134_v0  ;;  %324 = vmatpush.xpose.msk.msra.mxu0 %vm135_vm0, %v134_v0  ;;  %s241_s25 = scalar_lea.hbm %s625_s1, %s328_s17  ;;  %s133_s26 = scalar_lea.vmem [#allocation5], %s322_s20 }
  0x2a   : > { %v193_v9 = vshrl.u32 %v175_v7, 7  ;;  %v176_v11 = vand.u32 127, %v175_v7  ;;  %s243_s27 = sshll.u32 %s133_s26, 4  ;;  %s245_s29 = sshll.u32 %s241_s25, 4  ;;  %s244_s27 = int_to_ptr.vmem [resolvable:$true] %s243_s27  ;;  %s246_s29 = int_to_ptr.hbm [resolvable:$true] %s245_s29 }
  0x2b   : > { %v160_v2 = vsel %vm135_vm0, %v159_v1, 0.0  ;;  %s231_s10 = scalar_lea.sflag [#allocation4], %s579_s16  ;;  %s428_s2 = sshra.s32 %s246_s29, 4  ;;  %s429_s2 = int_to_ptr.hbm [resolvable:$true] %s428_s2 }
  0x2c   : > { %161 = vadd.xlane.f32.xlu0 %v160_v2  ;;  %325 = vmatmul.msk.f32.vlgmr.msra.gmra.mxu0 %vm135_vm0, %v134_v0  ;;  %vm194_vm4 = vcmp.ne.s32.totalorder %v193_v9, %v176_v11  ;;  %vm195_vm5 = vcmp.ge.s32.totalorder %v193_v9, 2  ;;  %vm224_vm9 = vcmp.eq.s32.totalorder %v176_v11, 1  ;;  %vm223_vm10 = vcmp.eq.s32.totalorder %v176_v11, 0  ;;  %s430_s3 = scalar_lea.hbm %s429_s2, 8  ;;  %s434_s11 = scalar_lea.hbm %s625_s1, 16 }
  0x2d   : > { %vm196_vm6 = vmand %vm194_vm4, %vm195_vm5  ;;  %p431_p6 = scmp.ne.s32.totalorder %s429_s2, %s430_s3  ;;  %p435_p0 = scmp.lt.s32.totalorder %s429_s2, %s625_s1 }
  0x2e   : > { %p436_p1 = scmp.lt.s32.totalorder %s434_s11, %s430_s3 }
  0x2f   : > { %p432_p9 = pnand %p431_p6, %p543_p11 }
  0x30   : > { %p437_p3 = por %p436_p1, %p435_p0 }
  0x31   : > { %p433_p13 = pneg %p432_p9 }
  0x33   : > { %p438_p4 = pnand %p437_p3, %p433_p13 }
  0x9f   : > { %v162_v3 = vpop.xlane.xlu0 %161 }
  0xa0   : > { %382 = vrsqrt.f32 %v162_v3  ;;  %vm169_vm2 = vweird.f32 %v162_v3 }
  0xa6   : > { %v383_v4 = vpop.eup %382 }
  0xa7   : > { %v164_v5 = vmul.f32 %v383_v4, %v162_v3  ;;  %vm170_vm1 = vweird.f32 %v383_v4 }
  0xa8   : > { %vm171_vm3 = vmor %vm169_vm2, %vm170_vm1 }
  0xa9   : > { %v165_v6 = vmul.f32 %v383_v4, %v164_v5  ;;  %v156_v12 = vpop.f32.mrf.mxu0 }
  0xab   : > { %v166_v8 = vmul.f32 0.5, %v165_v6 }
  0xad   : > { %v167_v10 = vsub.f32 1.5, %v166_v8 }
  0xaf   : > { %v168_v13 = vmul.f32 %v383_v4, %v167_v10 }
  0xb1   : > { %v172_v14 = vsel %vm171_vm3, %v383_v4, %v168_v13 }
  0xb2   : > { %v173_v15 = vmul.f32 %v172_v14, %v156_v12  ;;  %v177_v16 = vperm.slane %v172_v14, %v176_v11 }
  0xb4   : > { %v191_v17 = vmul.f32 %v177_v16, %v173_v15 }
  0xb6   : > { %v197_v18 = vsel %vm196_vm6, %v191_v17, 0.0 }
  0xb7   : > { %vm210_vm8 = vcmp.ne.f32.partialorder %v197_v18, 0.0  ;;  %v198_v19 = vand.u32 2147483647, %v197_v18 }
  0xb8   : > { %v326_v21 = vsel %vm210_vm8, 1.0, %v482_v20 }
  0xb9   : > { %v213_v22 = vsel %vm199_vm7, %v326_v21, 0.0  ;;  %v200_v23 = vsel %vm199_vm7, %v198_v19, 0.0 }
  0xba   : > { %214 = vadd.xlane.f32.xlu1 %v213_v22  ;;  %201 = vadd.xlane.f32.xlu0 %v200_v23 }
 0x12d   : > { %v215_v24 = vpop.xlane.xlu1 %214  ;;  %v202_v25 = vpop.xlane.xlu0 %201 }
 0x12e   : > { %v216_v26 = vrot.slane %v215_v24, 4  ;;  %v203_v27 = vrot.slane %v202_v25, 4 }
 0x130   : > { %v217_v28 = vadd.f32 %v216_v26, %v215_v24  ;;  %v204_v29 = vadd.f32 %v203_v27, %v202_v25 }
 0x132   : > { %v218_v30 = vrot.slane %v217_v28, 2  ;;  %v205_v31 = vrot.slane %v204_v29, 2 }
 0x134   : > { %v219_v32 = vadd.f32 %v218_v30, %v217_v28  ;;  %v206_v33 = vadd.f32 %v205_v31, %v204_v29 }
 0x136   : > { %v207_v34 = vrot.slane %v206_v33, 1  ;;  %v220_v35 = vrot.slane %v219_v32, 1 }
 0x138   : > { %v208_v36 = vadd.f32 %v207_v34, %v206_v33  ;;  %v221_v37 = vadd.f32 %v220_v35, %v219_v32 }
 0x13a   : > { %331 = vpush %v208_v36 }
 0x13b   : > { %333 = vpush %v221_v37 }
 0x16b   : > { %s332_s28 = spop %331 }
 0x16c   : > { %v227_v38 = vstv %s332_s28  ;;  %s334_s30 = spop %333 }
 0x16d   : > { %v225_v39 = vstv %s334_s30 }
 0x16e   : > { %v226_v40 = vsel %vm224_vm9, %v225_v39, 0.0 }
 0x16f   : > { %v228_v41 = vsel %vm223_vm10, %v227_v38, %v226_v40 }
 0x170   : > { %229 = vst [vmem:[%s133_s26] sm:$0xff] %v228_v41 }
 0x171   : > { %441 = shalt.err (!%p438_p4)
}
 0x172   : > { %337 = dma.vmem_to_hbm [thread:$0]  (%p543_p11), %s244_s27, 128, %s246_s29, %s231_s10  }
 0x173 PF: > { %s257_s16 = sand.u32 1, %s468_s6   ;;  %p631_p7 = scmp.ge.s32.totalorder %s480_s9, 2 }
 0x174   : > { %s258_s20 = scalar_lea.sflag [#allocation4], %s257_s16 }
 0x175   : > { %p344_p5 = pnand %p631_p7, %p547_p12 }
 0x177   : > { %p345_p8 = pneg %p344_p5 }
 0x179   : > { %463 = dma.done.wait (%p345_p8), %s258_s20, 128  }
 0x17a   : > { %465 = vsyncadd (%p345_p8), %s258_s20, 4294967168  ;;  %p14_p10 = scmp.ge.s32.totalorder %s518_s12, 4   ;;  %s632_s6 = smov %s472_s7 }
 0x17b   : > { %s633_s7 = smov %s476_s8  ;;  %s634_s8 = smov %s530_s15 }
 0x17c   : > { %s635_s9 = smov %s518_s12  ;;  %16 = sbr.rel (!%p14_p10) target bundleno = 5 (0x5), region = 69 }
 0x181   :  { %264 = vsyncpa [#allocation3], 1 }
 0x182   :  { %266 = vsyncpa [#allocation3 + $0x1], 1 }
 0x183   :  { %267 = vsyncpa [#allocation4], 1 }
 0x184   :  { %269 = vsyncpa [#allocation4 + $0x1], 1 }

</bundles_post_ra>
